<compile_context>
chip_gen: v6e
topology: v6e:2x2x1
jax: 0.10.0
libtpu: 0.0.40
codegen_flags: <defaults>
</compile_context>

<pallas_src>
import functools

import jax
import jax.numpy as jnp
from jax.experimental import pallas as pl
from jax.experimental.pallas import tpu as pltpu

LN_EPS = 1e-5


def _round_up(n, m):
    return (n + m - 1) // m * m


def rep_head_kernel(x_ref, wt_ref, bt_ref, wp_ref, bp_ref, g_ref, b_ref, o_ref,
                    *, h_valid):
    hp = x_ref.shape[-1]

    # transform: x @ W_t^T  (W_t pre-transposed to [in, out] on the host -> no XLU .T)
    h = jnp.dot(x_ref[...], wt_ref[...], preferred_element_type=jnp.float32)
    h = h + bt_ref[...]
    h = jnp.maximum(h, 0.0)                                    # ReLU (f32, VPU)

    # LayerNorm over the real hidden dim only (mask out the zero-padded lanes)
    if h_valid != hp:
        col = jax.lax.broadcasted_iota(jnp.int32, h.shape, 1)
        valid = col < h_valid
        h = jnp.where(valid, h, 0.0)

    inv_h = jnp.float32(1.0 / h_valid)
    mean = jnp.sum(h, axis=-1, keepdims=True) * inv_h
    centered = h - mean
    if h_valid != hp:
        centered = jnp.where(valid, centered, 0.0)
    var = jnp.sum(centered * centered, axis=-1, keepdims=True) * inv_h
    ln = centered * jax.lax.rsqrt(var + LN_EPS)
    ln = ln * g_ref[...] + b_ref[...]            # gamma/beta padded with zeros

    # projector: ln @ W_p^T (pre-transposed); bf16 MXU inputs, f32 accumulation
    out = jnp.dot(ln.astype(wp_ref.dtype), wp_ref[...],
                  preferred_element_type=jnp.float32)
    out = out + bp_ref[...]
    o_ref[...] = out.astype(o_ref.dtype)


def representation_head(x, w_t, b_t, w_p, b_p, gamma, beta, *,
                        tm=256, compute_dtype=jnp.bfloat16):
    """x: [B, S, H]. Weights in PyTorch nn.Linear layout [out, in]. Returns [B, S, H]."""
    B, S, H = x.shape
    N = B * S
    Hp = _round_up(H, 128)                       # lane-dense feature dim

    # Row tile: large for MXU utilization, 16-aligned (bf16 sublane packing),
    # never larger than the (padded) row count.
    tm_eff = max(16, min(tm, _round_up(N, 16)))
    Np = _round_up(N, tm_eff)

    cb = jnp.dtype(compute_dtype).itemsize
    ob = jnp.dtype(x.dtype).itemsize

    # Host-side prep: flatten rows, zero-pad, pre-transpose weights to [in, out],
    # cast MXU operands to the compute dtype (halves HBM->VMEM DMA bytes for bf16).
    x2 = jnp.pad(x.reshape(N, H), ((0, Np - N), (0, Hp - H))).astype(compute_dtype)
    wt_T = jnp.pad(w_t.T, ((0, Hp - H), (0, Hp - H))).astype(compute_dtype)
    wp_T = jnp.pad(w_p.T, ((0, Hp - H), (0, Hp - H))).astype(compute_dtype)
    bt2 = jnp.pad(b_t, (0, Hp - H)).reshape(1, Hp).astype(jnp.float32)
    bp2 = jnp.pad(b_p, (0, Hp - H)).reshape(1, Hp).astype(jnp.float32)
    g2 = jnp.pad(gamma, (0, Hp - H)).reshape(1, Hp).astype(jnp.float32)
    be2 = jnp.pad(beta, (0, Hp - H)).reshape(1, Hp).astype(jnp.float32)

    # VMEM budget: double-buffered weights + x/out tiles + small params, with headroom.
    vmem_need = (2 * 2 * Hp * Hp * cb            # two HxH weights, double-buffered
                 + 2 * tm_eff * Hp * cb          # x tile, double-buffered
                 + 2 * tm_eff * Hp * ob          # out tile, double-buffered
                 + 4 * 2 * Hp * 4)               # bias / gamma / beta
    vmem_limit = int(min(max(2 * vmem_need, 16 << 20), 64 << 20))

    cost = pl.CostEstimate(
        flops=4 * Np * Hp * Hp,                  # two N x Hp x Hp matmuls
        transcendentals=Np,                      # one rsqrt per row
        bytes_accessed=Np * Hp * (cb + ob) + 2 * Hp * Hp * cb + 4 * Hp * 4,
    )

    kernel = functools.partial(rep_head_kernel, h_valid=H)

    out = pl.pallas_call(
        kernel,
        out_shape=jax.ShapeDtypeStruct((Np, Hp), x.dtype),
        grid_spec=pltpu.PrefetchScalarGridSpec(
            num_scalar_prefetch=0,
            grid=(Np // tm_eff,),
            in_specs=[
                pl.BlockSpec((tm_eff, Hp), lambda i: (i, 0)),   # x rows
                pl.BlockSpec((Hp, Hp), lambda i: (0, 0)),       # W_t^T  [in, out]
                pl.BlockSpec((1, Hp), lambda i: (0, 0)),        # b_t
                pl.BlockSpec((Hp, Hp), lambda i: (0, 0)),       # W_p^T  [in, out]
                pl.BlockSpec((1, Hp), lambda i: (0, 0)),        # b_p
                pl.BlockSpec((1, Hp), lambda i: (0, 0)),        # gamma
                pl.BlockSpec((1, Hp), lambda i: (0, 0)),        # beta
            ],
            out_specs=pl.BlockSpec((tm_eff, Hp), lambda i: (i, 0)),
        ),
        compiler_params=pltpu.CompilerParams(
            dimension_semantics=("parallel",),   # lets v7x's 2 TCs split the row grid
            vmem_limit_bytes=vmem_limit),
        cost_estimate=cost,
    )(x2, wt_T, bt2, wp_T, bp2, g2, be2)

    return out[:N, :H].reshape(B, S, H)


def reference(x, w_t, b_t, w_p, b_p, gamma, beta):
    h = x @ w_t.T + b_t
    h = jnp.maximum(h, 0.0)
    mean = jnp.mean(h, axis=-1, keepdims=True)
    var = jnp.mean((h - mean) ** 2, axis=-1, keepdims=True)
    ln = (h - mean) / jnp.sqrt(var + LN_EPS) * gamma + beta
    return ln @ w_p.T + b_p


if __name__ == "__main__":
    B, S, H = 2, 8, 32

    key = jax.random.PRNGKey(0)
    x = jax.random.normal(key, (B, S, H), dtype=jnp.float32)

    # deterministic init matching RepresentationHead.post_init():
    #   transform.weight = I, projector.weight = I, biases = 0,
    #   LayerNorm gamma = 1, beta = 0 (torch defaults)
    w_t = jnp.eye(H, dtype=jnp.float32)
    b_t = jnp.zeros((H,), dtype=jnp.float32)
    w_p = jnp.eye(H, dtype=jnp.float32)
    b_p = jnp.zeros((H,), dtype=jnp.float32)
    gamma = jnp.ones((H,), dtype=jnp.float32)
    beta = jnp.zeros((H,), dtype=jnp.float32)

    ref = reference(x, w_t, b_t, w_p, b_p, gamma, beta)

    # exact-semantics check: f32 MXU path, tight tolerance
    out_f32 = representation_head(x, w_t, b_t, w_p, b_p, gamma, beta,
                                  compute_dtype=jnp.float32)
    out_f32 = jax.block_until_ready(out_f32)
    assert out_f32.shape == (B, S, H)
    assert jnp.allclose(out_f32, ref, atol=1e-5, rtol=1e-5), "f32 mismatch vs reference"

    # fast path: bf16 MXU inputs with f32 accumulation/epilogue, looser tolerance
    out_bf16 = representation_head(x, w_t, b_t, w_p, b_p, gamma, beta)
    out_bf16 = jax.block_until_ready(out_bf16)
    assert out_bf16.shape == (B, S, H)
    assert jnp.allclose(out_bf16, ref, atol=5e-2, rtol=5e-2), "bf16 mismatch vs reference"

    print("KERNEL_OK")
</pallas_src>

<mosaic_0001>
module attributes {stable_mosaic.version = 11 : i64} {
  func.func @rep_head_kernel(%arg0: i32, %arg1: memref<16x128xf32, #tpu.memory_space<vmem>>, %arg2: memref<128x128xf32, #tpu.memory_space<vmem>>, %arg3: memref<1x128xf32, #tpu.memory_space<vmem>>, %arg4: memref<128x128xf32, #tpu.memory_space<vmem>>, %arg5: memref<1x128xf32, #tpu.memory_space<vmem>>, %arg6: memref<1x128xf32, #tpu.memory_space<vmem>>, %arg7: memref<1x128xf32, #tpu.memory_space<vmem>>, %arg8: memref<16x128xf32, #tpu.memory_space<vmem>>) attributes {dimension_semantics = [#tpu.dimension_semantics<parallel>], iteration_bounds = array<i64: 1>, scalar_prefetch = 0 : i64, scratch_operands = 0 : i64, tpu.core_type = #tpu.core_type<tc>, window_params = [{transform_indices = @transform_0, window_bounds = array<i64: 16, 128>}, {pipeline_mode = #tpu.pipeline_mode<synchronous>, transform_indices = @transform_1, window_bounds = array<i64: 128, 128>}, {pipeline_mode = #tpu.pipeline_mode<synchronous>, transform_indices = @transform_2, window_bounds = array<i64: 1, 128>}, {pipeline_mode = #tpu.pipeline_mode<synchronous>, transform_indices = @transform_3, window_bounds = array<i64: 128, 128>}, {pipeline_mode = #tpu.pipeline_mode<synchronous>, transform_indices = @transform_4, window_bounds = array<i64: 1, 128>}, {pipeline_mode = #tpu.pipeline_mode<synchronous>, transform_indices = @transform_5, window_bounds = array<i64: 1, 128>}, {pipeline_mode = #tpu.pipeline_mode<synchronous>, transform_indices = @transform_6, window_bounds = array<i64: 1, 128>}, {transform_indices = @transform_7, window_bounds = array<i64: 16, 128>}]} {
    %c0 = arith.constant 0 : index
    %c0_0 = arith.constant 0 : index
    %0 = vector.load %arg1[%c0, %c0_0] : memref<16x128xf32, #tpu.memory_space<vmem>>, vector<16x128xf32>
    %c0_1 = arith.constant 0 : index
    %c0_2 = arith.constant 0 : index
    %1 = vector.load %arg2[%c0_1, %c0_2] : memref<128x128xf32, #tpu.memory_space<vmem>>, vector<128x128xf32>
    %cst = arith.constant dense<0.000000e+00> : vector<16x128xf32>
    %2 = tpu.matmul %0, %1, %cst {dimension_numbers = #tpu.dot_dimension_numbers<[1], [0], [0], [1], [0, 0, 1, 1], [], []>} : vector<16x128xf32>, vector<128x128xf32>, vector<16x128xf32> -> vector<16x128xf32>
    %c0_3 = arith.constant 0 : index
    %c0_4 = arith.constant 0 : index
    %3 = vector.load %arg3[%c0_3, %c0_4] : memref<1x128xf32, #tpu.memory_space<vmem>>, vector<1x128xf32>
    %4 = vector.broadcast %3 : vector<1x128xf32> to vector<16x128xf32>
    %5 = arith.addf %2, %4 : vector<16x128xf32>
    %cst_5 = arith.constant 0.000000e+00 : f32
    %6 = vector.broadcast %cst_5 : f32 to vector<16x128xf32>
    %7 = arith.maximumf %5, %6 : vector<16x128xf32>
    %8 = tpu.iota {dimensions = array<i32: 1>} : vector<16x128xi32>
    %c32_i32 = arith.constant 32 : i32
    %9 = vector.broadcast %c32_i32 : i32 to vector<16x128xi32>
    %10 = arith.cmpi slt, %8, %9 : vector<16x128xi32>
    %cst_6 = arith.constant 0.000000e+00 : f32
    %11 = vector.broadcast %cst_6 : f32 to vector<16x128xf32>
    %12 = arith.select %10, %7, %11 : vector<16x128xi1>, vector<16x128xf32>
    %cst_7 = arith.constant dense<0.000000e+00> : vector<16xf32>
    %13 = vector.multi_reduction <add>, %12, %cst_7 [1] : vector<16x128xf32> to vector<16xf32>
    %14 = vector.shape_cast %13 : vector<16xf32> to vector<16x1xf32>
    %cst_8 = arith.constant 3.125000e-02 : f32
    %15 = vector.broadcast %cst_8 : f32 to vector<16x1xf32>
    %16 = arith.mulf %14, %15 : vector<16x1xf32>
    %17 = vector.broadcast %16 : vector<16x1xf32> to vector<16x128xf32>
    %18 = arith.subf %12, %17 : vector<16x128xf32>
    %cst_9 = arith.constant 0.000000e+00 : f32
    %19 = vector.broadcast %cst_9 : f32 to vector<16x128xf32>
    %20 = arith.select %10, %18, %19 : vector<16x128xi1>, vector<16x128xf32>
    %21 = arith.mulf %20, %20 : vector<16x128xf32>
    %cst_10 = arith.constant dense<0.000000e+00> : vector<16xf32>
    %22 = vector.multi_reduction <add>, %21, %cst_10 [1] : vector<16x128xf32> to vector<16xf32>
    %23 = vector.shape_cast %22 : vector<16xf32> to vector<16x1xf32>
    %cst_11 = arith.constant 3.125000e-02 : f32
    %24 = vector.broadcast %cst_11 : f32 to vector<16x1xf32>
    %25 = arith.mulf %23, %24 : vector<16x1xf32>
    %cst_12 = arith.constant 9.99999974E-6 : f32
    %26 = vector.broadcast %cst_12 : f32 to vector<16x1xf32>
    %27 = arith.addf %25, %26 : vector<16x1xf32>
    %28 = math.rsqrt %27 : vector<16x1xf32>
    %29 = vector.broadcast %28 : vector<16x1xf32> to vector<16x128xf32>
    %30 = arith.mulf %20, %29 : vector<16x128xf32>
    %c0_13 = arith.constant 0 : index
    %c0_14 = arith.constant 0 : index
    %31 = vector.load %arg6[%c0_13, %c0_14] : memref<1x128xf32, #tpu.memory_space<vmem>>, vector<1x128xf32>
    %32 = vector.broadcast %31 : vector<1x128xf32> to vector<16x128xf32>
    %33 = arith.mulf %30, %32 : vector<16x128xf32>
    %c0_15 = arith.constant 0 : index
    %c0_16 = arith.constant 0 : index
    %34 = vector.load %arg7[%c0_15, %c0_16] : memref<1x128xf32, #tpu.memory_space<vmem>>, vector<1x128xf32>
    %35 = vector.broadcast %34 : vector<1x128xf32> to vector<16x128xf32>
    %36 = arith.addf %33, %35 : vector<16x128xf32>
    %c0_17 = arith.constant 0 : index
    %c0_18 = arith.constant 0 : index
    %37 = vector.load %arg4[%c0_17, %c0_18] : memref<128x128xf32, #tpu.memory_space<vmem>>, vector<128x128xf32>
    %cst_19 = arith.constant dense<0.000000e+00> : vector<16x128xf32>
    %38 = tpu.matmul %36, %37, %cst_19 {dimension_numbers = #tpu.dot_dimension_numbers<[1], [0], [0], [1], [0, 0, 1, 1], [], []>} : vector<16x128xf32>, vector<128x128xf32>, vector<16x128xf32> -> vector<16x128xf32>
    %c0_20 = arith.constant 0 : index
    %c0_21 = arith.constant 0 : index
    %39 = vector.load %arg5[%c0_20, %c0_21] : memref<1x128xf32, #tpu.memory_space<vmem>>, vector<1x128xf32>
    %40 = vector.broadcast %39 : vector<1x128xf32> to vector<16x128xf32>
    %41 = arith.addf %38, %40 : vector<16x128xf32>
    %c0_22 = arith.constant 0 : index
    %c0_23 = arith.constant 0 : index
    %42 = vector.load %arg8[%c0_22, %c0_23] : memref<16x128xf32, #tpu.memory_space<vmem>>, vector<16x128xf32>
    tpu.vector_store %arg8[%c0_22, %c0_23], %41 {strides = array<i32>} : memref<16x128xf32, #tpu.memory_space<vmem>>, vector<16x128xf32>,
    return
  }
  func.func @transform_0(%arg0: i32) -> (i32, i32) {
    %c0_i32 = arith.constant 0 : i32
    %c0_i32_0 = arith.constant 0 : i32
    return %arg0, %c0_i32 : i32, i32
  }
  func.func @transform_1(%arg0: i32) -> (i32, i32) {
    %c0_i32 = arith.constant 0 : i32
    %c0_i32_0 = arith.constant 0 : i32
    %c0_i32_1 = arith.constant 0 : i32
    return %c0_i32, %c0_i32_0 : i32, i32
  }
  func.func @transform_2(%arg0: i32) -> (i32, i32) {
    %c0_i32 = arith.constant 0 : i32
    %c0_i32_0 = arith.constant 0 : i32
    %c0_i32_1 = arith.constant 0 : i32
    return %c0_i32, %c0_i32_0 : i32, i32
  }
  func.func @transform_3(%arg0: i32) -> (i32, i32) {
    %c0_i32 = arith.constant 0 : i32
    %c0_i32_0 = arith.constant 0 : i32
    %c0_i32_1 = arith.constant 0 : i32
    return %c0_i32, %c0_i32_0 : i32, i32
  }
  func.func @transform_4(%arg0: i32) -> (i32, i32) {
    %c0_i32 = arith.constant 0 : i32
    %c0_i32_0 = arith.constant 0 : i32
    %c0_i32_1 = arith.constant 0 : i32
    return %c0_i32, %c0_i32_0 : i32, i32
  }
  func.func @transform_5(%arg0: i32) -> (i32, i32) {
    %c0_i32 = arith.constant 0 : i32
    %c0_i32_0 = arith.constant 0 : i32
    %c0_i32_1 = arith.constant 0 : i32
    return %c0_i32, %c0_i32_0 : i32, i32
  }
  func.func @transform_6(%arg0: i32) -> (i32, i32) {
    %c0_i32 = arith.constant 0 : i32
    %c0_i32_0 = arith.constant 0 : i32
    %c0_i32_1 = arith.constant 0 : i32
    return %c0_i32, %c0_i32_0 : i32, i32
  }
  func.func @transform_7(%arg0: i32) -> (i32, i32) {
    %c0_i32 = arith.constant 0 : i32
    %c0_i32_0 = arith.constant 0 : i32
    return %arg0, %c0_i32 : i32, i32
  }
}

</mosaic_0001>

<bundles_post_ra>
// kernel: tpu_custom_call.1
= control target key start
LH: loop header
LB: loop body
LE: loop exit
PB: predicated region body
PF: predicated region fallthrough
CT: control target
= control target key end

     0   :  { %12 = vsyncpa [#allocation3], 0  ;;  %s627_s0 = inlined_call_operand.hbm [shape: f32[16,128], index: 0, kind: input, shape index: {}]   ;;  %s628_s1 = inlined_call_operand.hbm [shape: f32[128,128], index: 1, kind: input, shape index: {}]   ;;  %s629_s2 = inlined_call_operand.vmem [shape: f32[1,128], index: 2, kind: input, shape index: {}]   ;;  %s630_s3 = inlined_call_operand.hbm [shape: f32[128,128], index: 3, kind: input, shape index: {}]   ;;  %s631_s4 = inlined_call_operand.vmem [shape: f32[1,128], index: 4, kind: input, shape index: {}]   ;;  %s632_s5 = inlined_call_operand.vmem [shape: f32[1,128], index: 5, kind: input, shape index: {}]   ;;  %s633_s6 = inlined_call_operand.vmem [shape: f32[1,128], index: 6, kind: input, shape index: {}]   ;;  %s634_s7 = inlined_call_operand.hbm [shape: f32[16,128], index: 7, kind: output, shape index: {}]  }
   0x1   :  { %13 = vsyncpa [#allocation6], 0 }
   0x2   :  { %14 = vsyncpa [#allocation4], 0  ;;  %s541_s24 = smov [#allocation5]   ;;  %s542_s26 = smov [#allocation2]  }
   0x3   :  { %s32_s25 = sshll.u32 %s541_s24, 4  ;;  %s20_s27 = sshll.u32 %s542_s26, 4  ;;  %s33_s25 = int_to_ptr.vmem [resolvable:$true] %s32_s25  ;;  %s21_s27 = int_to_ptr.vmem [resolvable:$true] %s20_s27 }
   0x4   :  { %s463_s28 = scalar_lea.vmem %s33_s25, 2048  ;;  %p468_p1 = scmp.lt.s32.totalorder %s33_s25, %s33_s25 }
   0x5   :  { %p464_p0 = scmp.ne.s32.totalorder %s33_s25, %s463_s28  ;;  %p469_p2 = scmp.lt.s32.totalorder %s463_s28, %s463_s28 }
   0x7   :  { %p470_p3 = por %p469_p2, %p468_p1 }
   0x9   :  { %p471_p4 = pnand %p470_p3, %p464_p0 }
   0xb   :  { %474 = shalt.err (!%p471_p4)
}
   0xc   :  { %s543_s29 = smov 128   ;;  %s544_s30 = smov 8  }
   0xd   :  { %38 = dma.hbm_to_vmem [thread:$0]  %s628_s1, 2048, %s33_s25, [#allocation6], %s543_s29, %s543_s29, %s544_s30  }
   0xe   :  { %s483_s10 = scalar_lea.vmem %s21_s27, 256  ;;  %p488_p6 = scmp.lt.s32.totalorder %s21_s27, %s21_s27 }
   0xf   :  { %p484_p5 = scmp.ne.s32.totalorder %s21_s27, %s483_s10  ;;  %p489_p7 = scmp.lt.s32.totalorder %s483_s10, %s483_s10 }
  0x11   :  { %p490_p8 = por %p489_p7, %p488_p6 }
  0x13   :  { %p491_p9 = pnand %p490_p8, %p484_p5 }
  0x15   :  { %494 = shalt.err (!%p491_p9)
}
  0x16   :  { %26 = dma.hbm_to_vmem [thread:$0]  %s627_s0, 256, %s21_s27, [#allocation3], %s543_s29, %s543_s29, %s544_s30  }
  0x17   :  { %s545_s13 = smov [#allocation7]  }
  0x18   :  { %s46_s14 = sshll.u32 %s545_s13, 4  ;;  %s47_s14 = int_to_ptr.vmem [resolvable:$true] %s46_s14 }
  0x19   :  { %s503_s15 = scalar_lea.vmem %s47_s14, 2048  ;;  %p508_p11 = scmp.lt.s32.totalorder %s47_s14, %s47_s14 }
  0x1a   :  { %p504_p10 = scmp.ne.s32.totalorder %s47_s14, %s503_s15  ;;  %p509_p12 = scmp.lt.s32.totalorder %s503_s15, %s503_s15 }
  0x1c   :  { %p510_p13 = por %p509_p12, %p508_p11 }
  0x1e   :  { %p511_p0 = pnand %p510_p13, %p504_p10 }
  0x20   :  { %514 = shalt.err (!%p511_p0)
}
  0x21   :  { %52 = dma.hbm_to_vmem [thread:$0]  %s630_s3, 2048, %s47_s14, [#allocation6], %s543_s29, %s543_s29, %s544_s30  }
  0x22   :  { %535 = dma.done.wait [#allocation3], 256  }
  0x23   :  { %536 = vsyncadd [#allocation3], 4294967040 }
  0x24   :  { %537 = dma.done.wait [#allocation6], 4096  }
  0x25   :  { %538 = vsyncadd [#allocation6], 4294963200  ;;  %v85_v0 = vld [vmem:[#allocation5 + $0x78] sm:$0xff]  ;;  %v84_v1 = vld [vmem:[#allocation5 + $0x70] sm:$0xff]  ;;  %v170_v18 = vlaneseq  ;;  %s546_s22 = smov [#allocation8]  }
  0x26   :  { %375 = vmatprep.subr.mxu0 %v85_v0  ;;  %v83_v2 = vld [vmem:[#allocation5 + $0x68] sm:$0xff]  ;;  %v82_v3 = vld [vmem:[#allocation5 + $0x60] sm:$0xff]  ;;  %v68_v4 = vld [vmem:[#allocation2] sm:$0xff] }
  0x27   :  { %376 = vmatpush3.msra.mxu0 %v85_v0  ;;  %v81_v5 = vld [vmem:[#allocation5 + $0x58] sm:$0xff]  ;;  %407 = vmatprep.mubr.f32.mxu0 %v68_v4  ;;  %v80_v6 = vld [vmem:[#allocation5 + $0x50] sm:$0xff]  ;;  %v79_v7 = vld [vmem:[#allocation5 + $0x48] sm:$0xff]  ;;  %v171_v22 = vand.u32 127, %v170_v18 }
  0x28   :  { %377 = vmatprep.subr.mxu0 %v84_v1  ;;  %v78_v8 = vld [vmem:[#allocation5 + $0x40] sm:$0xff]  ;;  %v77_v9 = vld [vmem:[#allocation5 + $0x38] sm:$0xff]  ;;  %v76_v10 = vld [vmem:[#allocation5 + $0x30] sm:$0xff] }
  0x29   :  { %378 = vmatpush3.msra.mxu0 %v84_v1  ;;  %v75_v11 = vld [vmem:[#allocation5 + $0x28] sm:$0xff]  ;;  %v74_v12 = vld [vmem:[#allocation5 + $0x20] sm:$0xff]  ;;  %v73_v13 = vld [vmem:[#allocation5 + $0x18] sm:$0xff]  ;;  %vm172_vm0 = vcmp.lt.s32.totalorder %v171_v22, 32 }
  0x2a   :  { %379 = vmatprep.subr.mxu0 %v83_v2  ;;  %v72_v14 = vld [vmem:[#allocation5 + $0x10] sm:$0xff]  ;;  %v71_v15 = vld [vmem:[#allocation5 + $0x8] sm:$0xff]  ;;  %v70_v16 = vld [vmem:[#allocation5] sm:$0xff] }
  0x2b   :  { %380 = vmatpush3.msra.mxu0 %v83_v2  ;;  %v69_v17 = vld [vmem:[#allocation2 + $0x8] sm:$0xff]  ;;  %v335_v20 = vld [vmem:[%s629_s2] ss:$0 sm:$0xff]  ;;  %v230_v41 = vld [vmem:[#allocation7 + $0x68] sm:$0xff] }
  0x2c   :  { %381 = vmatprep.subr.mxu0 %v82_v3  ;;  %v232_v29 = vld [vmem:[#allocation7 + $0x78] sm:$0xff]  ;;  %v231_v30 = vld [vmem:[#allocation7 + $0x70] sm:$0xff]  ;;  %v229_v42 = vld [vmem:[#allocation7 + $0x60] sm:$0xff] }
  0x2d   :  { %382 = vmatpush3.msra.mxu0 %v82_v3  ;;  %410 = vmatprep.subr.mxu1 %v232_v29  ;;  %v228_v43 = vld [vmem:[#allocation7 + $0x58] sm:$0xff]  ;;  %v227_v44 = vld [vmem:[#allocation7 + $0x50] sm:$0xff]  ;;  %v226_v45 = vld [vmem:[#allocation7 + $0x48] sm:$0xff] }
  0x2e   :  { %383 = vmatprep.subr.mxu0 %v81_v5  ;;  %411 = vmatpush3.msra.mxu1 %v232_v29  ;;  %v225_v46 = vld [vmem:[#allocation7 + $0x40] sm:$0xff]  ;;  %v224_v47 = vld [vmem:[#allocation7 + $0x38] sm:$0xff]  ;;  %v223_v48 = vld [vmem:[#allocation7 + $0x30] sm:$0xff] }
  0x2f   :  { %384 = vmatpush3.msra.mxu0 %v81_v5  ;;  %412 = vmatprep.subr.mxu1 %v231_v30  ;;  %v222_v49 = vld [vmem:[#allocation7 + $0x28] sm:$0xff]  ;;  %v221_v50 = vld [vmem:[#allocation7 + $0x20] sm:$0xff]  ;;  %v220_v51 = vld [vmem:[#allocation7 + $0x18] sm:$0xff] }
  0x30   :  { %385 = vmatprep.subr.mxu0 %v80_v6  ;;  %413 = vmatpush3.msra.mxu1 %v231_v30  ;;  %v219_v52 = vld [vmem:[#allocation7 + $0x10] sm:$0xff]  ;;  %v218_v53 = vld [vmem:[#allocation7 + $0x8] sm:$0xff]  ;;  %v217_v54 = vld [vmem:[#allocation7] sm:$0xff] }
  0x31   :  { %386 = vmatpush3.msra.mxu0 %v80_v6  ;;  %414 = vmatprep.subr.mxu1 %v230_v41  ;;  %v336_v62 = vld [vmem:[%s632_s5] ss:$0 sm:$0xff]  ;;  %s322_s5 = sshll.u32 %s546_s22, 4  ;;  %s323_s5 = int_to_ptr.vmem [resolvable:$true] %s322_s5 }
  0x32   :  { %387 = vmatprep.subr.mxu0 %v79_v7  ;;  %415 = vmatpush3.msra.mxu1 %v230_v41  ;;  %v337_v0 = vld [vmem:[%s633_s6] ss:$0 sm:$0xff]  ;;  %s515_s6 = scalar_lea.vmem %s323_s5, 256  ;;  %p520_p2 = scmp.lt.s32.totalorder %s323_s5, %s323_s5 }
  0x33   :  { %388 = vmatpush3.msra.mxu0 %v79_v7  ;;  %416 = vmatprep.subr.mxu1 %v229_v42  ;;  %v338_v7 = vld [vmem:[%s631_s4] ss:$0 sm:$0xff]  ;;  %p516_p1 = scmp.ne.s32.totalorder %s323_s5, %s515_s6  ;;  %p521_p3 = scmp.lt.s32.totalorder %s515_s6, %s515_s6 }
  0x34   :  { %389 = vmatprep.subr.mxu0 %v78_v8  ;;  %417 = vmatpush3.msra.mxu1 %v229_v42 }
  0x35   :  { %390 = vmatpush3.msra.mxu0 %v78_v8  ;;  %418 = vmatprep.subr.mxu1 %v228_v43  ;;  %p522_p4 = por %p521_p3, %p520_p2 }
  0x36   :  { %391 = vmatprep.subr.mxu0 %v77_v9  ;;  %419 = vmatpush3.msra.mxu1 %v228_v43 }
  0x37   :  { %392 = vmatpush3.msra.mxu0 %v77_v9  ;;  %420 = vmatprep.subr.mxu1 %v227_v44  ;;  %p523_p5 = pnand %p522_p4, %p516_p1 }
  0x38   :  { %393 = vmatprep.subr.mxu0 %v76_v10  ;;  %421 = vmatpush3.msra.mxu1 %v227_v44 }
  0x39   :  { %394 = vmatpush3.msra.mxu0 %v76_v10  ;;  %422 = vmatprep.subr.mxu1 %v226_v45 }
  0x3a   :  { %395 = vmatprep.subr.mxu0 %v75_v11  ;;  %423 = vmatpush3.msra.mxu1 %v226_v45 }
  0x3b   :  { %396 = vmatpush3.msra.mxu0 %v75_v11  ;;  %424 = vmatprep.subr.mxu1 %v225_v46 }
  0x3c   :  { %397 = vmatprep.subr.mxu0 %v74_v12  ;;  %425 = vmatpush3.msra.mxu1 %v225_v46 }
  0x3d   :  { %398 = vmatpush3.msra.mxu0 %v74_v12  ;;  %426 = vmatprep.subr.mxu1 %v224_v47 }
  0x3e   :  { %399 = vmatprep.subr.mxu0 %v73_v13  ;;  %427 = vmatpush3.msra.mxu1 %v224_v47 }
  0x3f   :  { %400 = vmatpush3.msra.mxu0 %v73_v13  ;;  %428 = vmatprep.subr.mxu1 %v223_v48 }
  0x40   :  { %401 = vmatprep.subr.mxu0 %v72_v14  ;;  %429 = vmatpush3.msra.mxu1 %v223_v48 }
  0x41   :  { %402 = vmatpush3.msra.mxu0 %v72_v14  ;;  %430 = vmatprep.subr.mxu1 %v222_v49 }
  0x42   :  { %403 = vmatprep.subr.mxu0 %v71_v15  ;;  %431 = vmatpush3.msra.mxu1 %v222_v49 }
  0x43   :  { %404 = vmatpush3.msra.mxu0 %v71_v15  ;;  %432 = vmatprep.subr.mxu1 %v221_v50 }
  0x44   :  { %405 = vmatprep.subr.mxu0 %v70_v16  ;;  %433 = vmatpush3.msra.mxu1 %v221_v50 }
  0x45   :  { %406 = vmatpush3.msra.mxu0 %v70_v16  ;;  %434 = vmatprep.subr.mxu1 %v220_v51 }
  0x46   :  { %408 = vmatmul.mubr.f32.vlgmr.msra.gmra.mxu0 %v69_v17  ;;  %435 = vmatpush3.msra.mxu1 %v220_v51 }
  0x47   :  { %436 = vmatprep.subr.mxu1 %v219_v52 }
  0x48   :  { %437 = vmatpush3.msra.mxu1 %v219_v52 }
  0x49   :  { %438 = vmatprep.subr.mxu1 %v218_v53 }
  0x4a   :  { %439 = vmatpush3.msra.mxu1 %v218_v53 }
  0x4b   :  { %440 = vmatprep.subr.mxu1 %v217_v54 }
  0x4c   :  { %441 = vmatpush3.msra.mxu1 %v217_v54 }
 0x106   :  { %v409_v19 = vpop.f32.mrf.mxu0 }
 0x107   :  { %v165_v23 = vadd.f32 %v409_v19, %v335_v20 }
 0x108   :  { %v159_v21 = vpop.f32.mrf.mxu0 }
 0x109   :  { %v160_v24 = vadd.f32 %v335_v20, %v159_v21  ;;  %v169_v26 = vmax.f32 %v165_v23, 0.0 }
 0x10b   :  { %v168_v25 = vmax.f32 %v160_v24, 0.0  ;;  %v174_v28 = vsel %vm172_vm0, %v169_v26, 0.0 }
 0x10d   :  { %v173_v27 = vsel %vm172_vm0, %v168_v25, 0.0 }
 0x10e   :  { %175 = vadd.xlane.f32.xlu0 %v173_v27 }
 0x112   :  { %177 = vadd.xlane.f32.xlu0 %v174_v28 }
 0x197   :  { %v176_v31 = vpop.xlane.xlu0 %175 }
 0x198   :  { %v179_v32 = vmul.f32 0.03125, %v176_v31 }
 0x19a   :  { %v181_v33 = vsub.f32 %v173_v27, %v179_v32 }
 0x19b   :  { %v178_v34 = vpop.xlane.xlu0 %177 }
 0x19c   :  { %v180_v35 = vmul.f32 0.03125, %v178_v34  ;;  %v183_v36 = vsel %vm172_vm0, %v181_v33, 0.0 }
 0x19d   :  { %v185_v37 = vmul.f32 %v183_v36, %v183_v36 }
 0x19e   :  { %v182_v38 = vsub.f32 %v174_v28, %v180_v35 }
 0x19f   :  { %187 = vadd.xlane.f32.xlu1 %v185_v37 }
 0x1a0   :  { %v184_v39 = vsel %vm172_vm0, %v182_v38, 0.0 }
 0x1a1   :  { %v186_v40 = vmul.f32 %v184_v39, %v184_v39 }
 0x1a3   :  { %189 = vadd.xlane.f32.xlu1 %v186_v40 }
 0x228   :  { %v188_v55 = vpop.xlane.xlu1 %187 }
 0x229   :  { %v191_v56 = vmul.f32 0.03125, %v188_v55 }
 0x22b   :  { %v193_v57 = vadd.f32 1e-05, %v191_v56 }
 0x22c   :  { %v190_v58 = vpop.xlane.xlu1 %189 }
 0x22d   :  { %451 = vrsqrt.f32 %v193_v57  ;;  %v192_v59 = vmul.f32 0.03125, %v190_v58 }
 0x22f   :  { %v194_v60 = vadd.f32 1e-05, %v192_v59 }
 0x231   :  { %453 = vrsqrt.f32 %v194_v60 }
 0x23a   :  { %v452_v61 = vpop.eup %451 }
 0x23b   :  { %v197_v63 = vmul.f32 %v452_v61, %v183_v36 }
 0x23d   :  { %v206_v1 = vmul.f32 %v336_v62, %v197_v63 }
 0x23e   :  { %v454_v2 = vpop.eup %453 }
 0x23f   :  { %v198_v3 = vmul.f32 %v454_v2, %v184_v39  ;;  %v215_v4 = vadd.f32 %v337_v0, %v206_v1 }
 0x241   :  { %v207_v5 = vmul.f32 %v336_v62, %v198_v3  ;;  %442 = vmatprep.mubr.f32.mxu1 %v215_v4 }
 0x243   :  { %v216_v6 = vadd.f32 %v337_v0, %v207_v5 }
 0x245   :  { %443 = vmatmul.mubr.f32.vlgmr.msra.gmra.mxu1 %v216_v6 }
 0x305   :  { %v444_v8 = vpop.f32.mrf.mxu1 }
 0x306   :  { %v312_v9 = vadd.f32 %v444_v8, %v338_v7 }
 0x307   :  { %v306_v10 = vpop.f32.mrf.mxu1 }
 0x308   :  { %316 = vst [vmem:[#allocation8 + $0x8] sm:$0xff] %v312_v9  ;;  %v307_v11 = vadd.f32 %v338_v7, %v306_v10 }
 0x30a   :  { %315 = vst [vmem:[#allocation8] sm:$0xff] %v307_v11 }
 0x30b   :  { %526 = shalt.err (!%p523_p5)
}
 0x30c   :  { %328 = dma.vmem_to_hbm [thread:$0]  %s323_s5, 256, %s634_s7, [#allocation4], %s543_s29, %s543_s29, %s544_s30  }
 0x30d   :  { %539 = dma.done.wait [#allocation4], 256  }
 0x30e   :  { %540 = vsyncadd [#allocation4], 4294967040 }
 0x30f   :  { %332 = vsyncpa [#allocation3], 1 }
 0x310   :  { %333 = vsyncpa [#allocation6], 1 }
 0x311   :  { %334 = vsyncpa [#allocation4], 1 }

</bundles_post_ra>
